<compile_context>
chip_gen: v5e
topology: v5e:2x2
jax: 0.10.0
libtpu: 0.0.40
codegen_flags: <defaults>
</compile_context>

<pallas_src>
import jax
import jax.numpy as jnp
from jax.experimental import pallas as pl
from jax.experimental.pallas import tpu as pltpu

_LANE = 128
_SUBLANE = 8
_TARGET_BLOCK_BYTES = 4 * 1024 * 1024   # ~4 MiB/block: safe on v7x (64 MiB VMEM)
_VMEM_LIMIT_BYTES = 32 * 1024 * 1024    # 4 x 4 MiB double-buffered + headroom


def _exp_kernel(x_ref, o_ref):
    # Elementwise exponential on the current VMEM tile (EUP transcendental path;
    # bf16 inputs on v5e get VPU up/down casts inserted automatically).
    o_ref[...] = jnp.exp(x_ref[...])


def _choose_cols(total):
    """Largest lane-dense column count (multiple of 128) dividing `total`,
    preferring factorizations whose row count is also sublane-dense (% 8 == 0)."""
    candidates = (2048, 1024, 512, 256, 128)
    for c in candidates:
        if total % c == 0 and (total // c) % _SUBLANE == 0:
            return c
    for c in candidates:
        if total % c == 0:
            return c
    return None


def _exp_2d(x2d, *, donate_input=False):
    rows, cols = x2d.shape
    itemsize = jnp.dtype(x2d.dtype).itemsize

    # Block rows: as many as fit in ~4 MiB, rounded down to a sublane multiple.
    tile_rows = max(
        _SUBLANE,
        (_TARGET_BLOCK_BYTES // (cols * itemsize)) // _SUBLANE * _SUBLANE,
    )
    tile_rows = min(tile_rows, rows)

    grid = (pl.cdiv(rows, tile_rows),)

    return pl.pallas_call(
        _exp_kernel,
        out_shape=jax.ShapeDtypeStruct((rows, cols), x2d.dtype),
        grid_spec=pltpu.PrefetchScalarGridSpec(
            num_scalar_prefetch=0,
            grid=grid,
            in_specs=[pl.BlockSpec((tile_rows, cols), lambda i: (i, 0))],
            out_specs=pl.BlockSpec((tile_rows, cols), lambda i: (i, 0)),
        ),
        compiler_params=pltpu.CompilerParams(
            dimension_semantics=("parallel",),
            vmem_limit_bytes=_VMEM_LIMIT_BYTES,
        ),
        input_output_aliases=({0: 0} if donate_input else {}),
    )(x2d)


def exp_activation(x, *, donate_input=False):
    """Applies elementwise exp via a Pallas TPU kernel. Works for any shape."""
    x = jnp.asarray(x)
    orig_shape = x.shape
    total = x.size

    if total == 0:
        return x  # empty input: nothing to compute

    cols = _choose_cols(total)
    if cols is not None:
        # Fast path: pure metadata reshapes, no HBM pad/unpad copies.
        out2d = _exp_2d(x.reshape(total // cols, cols), donate_input=donate_input)
        return out2d.reshape(orig_shape)

    # Ragged fallback: flattened size not a multiple of 128. Pad up to a
    # (8*128)-multiple, run, then slice the tail off (exp(0)=1 is discarded).
    chunk = _SUBLANE * _LANE
    padded = ((total + chunk - 1) // chunk) * chunk
    x_flat = jnp.concatenate(
        [jnp.ravel(x), jnp.zeros((padded - total,), dtype=x.dtype)]
    )
    pad_cols = _choose_cols(padded)
    out2d = _exp_2d(x_flat.reshape(padded // pad_cols, pad_cols))
    return out2d.reshape(-1)[:total].reshape(orig_shape)


if __name__ == "__main__":
    key = jax.random.PRNGKey(0)
    # Small NCHW input consistent with typical conv activations.
    x = jax.random.normal(key, (2, 4, 16, 16), dtype=jnp.float32)

    y = exp_activation(x)
    y = jax.block_until_ready(y)

    # Correctness check against plain JAX reference.
    ref = jnp.exp(x)
    assert y.shape == x.shape and y.dtype == x.dtype
    assert jnp.allclose(y, ref, rtol=1e-6, atol=1e-6)

    # Also exercise the ragged fallback (flattened size not a multiple of 128).
    x2 = jax.random.normal(jax.random.PRNGKey(1), (3, 5, 7), dtype=jnp.float32)
    y2 = jax.block_until_ready(exp_activation(x2))
    assert y2.shape == x2.shape and y2.dtype == x2.dtype
    assert jnp.allclose(y2, jnp.exp(x2), rtol=1e-6, atol=1e-6)

    print("KERNEL_OK")
</pallas_src>

<mosaic_0001>
module attributes {stable_mosaic.version = 11 : i64} {
  func.func @_exp_kernel(%arg0: i32, %arg1: memref<8x256xf32, #tpu.memory_space<vmem>>, %arg2: memref<8x256xf32, #tpu.memory_space<vmem>>) attributes {dimension_semantics = [#tpu.dimension_semantics<parallel>], iteration_bounds = array<i64: 1>, scalar_prefetch = 0 : i64, scratch_operands = 0 : i64, tpu.core_type = #tpu.core_type<tc>, window_params = [{transform_indices = @transform_0, window_bounds = array<i64: 8, 256>}, {transform_indices = @transform_1, window_bounds = array<i64: 8, 256>}]} {
    %c0 = arith.constant 0 : index
    %c0_0 = arith.constant 0 : index
    %0 = vector.load %arg1[%c0, %c0_0] : memref<8x256xf32, #tpu.memory_space<vmem>>, vector<8x256xf32>
    %1 = math.exp %0 : vector<8x256xf32>
    %c0_1 = arith.constant 0 : index
    %c0_2 = arith.constant 0 : index
    %2 = vector.load %arg2[%c0_1, %c0_2] : memref<8x256xf32, #tpu.memory_space<vmem>>, vector<8x256xf32>
    tpu.vector_store %arg2[%c0_1, %c0_2], %1 {strides = array<i32>} : memref<8x256xf32, #tpu.memory_space<vmem>>, vector<8x256xf32>,
    return
  }
  func.func @transform_0(%arg0: i32) -> (i32, i32) {
    %c0_i32 = arith.constant 0 : i32
    %c0_i32_0 = arith.constant 0 : i32
    return %arg0, %c0_i32 : i32, i32
  }
  func.func @transform_1(%arg0: i32) -> (i32, i32) {
    %c0_i32 = arith.constant 0 : i32
    %c0_i32_0 = arith.constant 0 : i32
    return %arg0, %c0_i32 : i32, i32
  }
}

</mosaic_0001>

<bundles_post_ra>
// kernel: tpu_custom_call.1
= control target key start
LH: loop header
LB: loop body
LE: loop exit
PB: predicated region body
PF: predicated region fallthrough
CT: control target
= control target key end

     0   :  { %6 = vsyncpa [#allocation3], 0  ;;  %s124_s0 = inlined_call_operand.hbm [shape: f32[8,256], index: 0, kind: input, shape index: {}]   ;;  %s125_s1 = inlined_call_operand.hbm [shape: f32[8,256], index: 1, kind: output, shape index: {}]  }
   0x1   :  { %7 = vsyncpa [#allocation4], 0  ;;  %s13_s8 = sshll.u32 %s124_s0, 4  ;;  %s106_s9 = smov [#allocation2]   ;;  %s14_s8 = int_to_ptr.hbm [resolvable:$true] %s13_s8 }
   0x2   :  { %s15_s10 = sshll.u32 %s106_s9, 4  ;;  %s16_s10 = int_to_ptr.vmem [resolvable:$true] %s15_s10 }
   0x3   :  { %18 = dma.hbm_to_vmem [thread:$0]  %s14_s8, 256, %s16_s10, [#allocation3]  }
   0x4   :  { %102 = dma.done.wait [#allocation3], 256  }
   0x5   :  { %103 = vsyncadd [#allocation3], 4294967040  ;;  %v23_v0 = vld [vmem:[#allocation2] sm:$0xff]  ;;  %v24_v1 = vld [vmem:[#allocation2 + $0x8] sm:$0xff]  ;;  %s107_s11 = smov [#allocation5]   ;;  %s38_s15 = sshll.u32 %s125_s1, 4  ;;  %s39_s15 = int_to_ptr.hbm [resolvable:$true] %s38_s15 }
   0x6   :  { %v25_v2 = vmul.f32 1.442695, %v23_v0  ;;  %v27_v3 = vmul.f32 1.442695, %v24_v1  ;;  %s36_s12 = sshll.u32 %s107_s11, 4  ;;  %s37_s12 = int_to_ptr.vmem [resolvable:$true] %s36_s12 }
   0x8   :  { %50 = vpow2.f32 %v25_v2 }
   0x9   :  { %52 = vpow2.f32 %v27_v3 }
   0xe   :  { %v51_v4 = vpop.eup %50 }
   0xf   :  { %v53_v5 = vpop.eup %52  ;;  %29 = vst [vmem:[#allocation5] sm:$0xff] %v51_v4 }
  0x10   :  { %30 = vst [vmem:[#allocation5 + $0x8] sm:$0xff] %v53_v5 }
  0x11   :  { %41 = dma.vmem_to_hbm [thread:$0]  %s37_s12, 256, %s39_s15, [#allocation4]  }
  0x12   :  { %104 = dma.done.wait [#allocation4], 256  }
  0x13   :  { %105 = vsyncadd [#allocation4], 4294967040 }
  0x14   :  { %46 = vsyncpa [#allocation3], 1 }
  0x15   :  { %47 = vsyncpa [#allocation4], 1 }

</bundles_post_ra>
